<compile_context>
chip_gen: v5e
topology: v5e:2x2
jax: 0.10.0
libtpu: 0.0.40
codegen_flags: <defaults>
</compile_context>

<pallas_src>
import jax
import jax.numpy as jnp
from jax.experimental import pallas as pl
from jax.experimental.pallas import tpu as pltpu


# ---------------------------------------------------------------------------
# Model dimensions (synthetic G / D)
# ---------------------------------------------------------------------------

N_CLASSES = 10
DIM_Z = 32
SHARED_DIM = 16
G_CH = 16
D_CH = 16
IMG = 16          # output resolution
BOTTOM = 4        # generator bottom spatial size
S0 = BOTTOM * BOTTOM


# ---------------------------------------------------------------------------
# Pallas kernels
# ---------------------------------------------------------------------------

def _gen_kernel(zc_ref, w_ref, b_ref, o_ref):
    """Generator hot path: o = tanh(zc @ W_fused + b_fused).

    W_fused is the exact fold of the z||y linear with the 1x1 conv (both linear,
    no activation in between), built once in preprocess_params(); no kron /
    structural zeros.  Output is bottom-resolution (3, S0)-flat per row; the
    nearest-neighbour upsample happens in the wrapper (commutes with the
    pointwise 1x1 conv + tanh).
    """
    h = jnp.dot(zc_ref[...], w_ref[...], preferred_element_type=jnp.float32)
    o_ref[...] = jnp.tanh(h + b_ref[...])


def _make_disc_kernel(seg_srcs, need_x, need_t):
    """Build the fused discriminator kernel for a static segment list.

    One grid step handles every segment and every sample:
        (optional) mixed = t * x + (1 - t) * G_z        (fused mixup blend)
        h    = relu(Wc @ inp + bc)      per segment, batched over samples
        pool = sum_s h                  dense lane reduction
        out  = (wd + embed[y]) . pool + bd              projection head
        mid  = pool
    """
    def kernel(*refs):
        i = 0
        gz_ref = refs[i]; i += 1
        x_ref = refs[i] if need_x else None; i += int(need_x)
        t_ref = refs[i] if need_t else None; i += int(need_t)
        emb_ref, wc_ref, bc_ref, wd_ref, bd_ref = refs[i:i + 5]; i += 5
        out_ref, mid_ref = refs[i:i + 2]; i += 2
        mixed_ref = refs[i] if need_t else None

        n, _, _ = gz_ref.shape
        d_ch, c = wc_ref.shape

        gz = gz_ref[...]                               # (N, C, S) f32
        x = x_ref[...] if need_x else None
        srcs = {"gz": gz}
        if need_x:
            srcs["x"] = x
        if need_t:
            t = t_ref[...]                             # (N, 1, S)
            mixed = t * x + (1.0 - t) * gz             # blend fused in-kernel
            mixed_ref[...] = mixed                     # written to HBM once
            srcs["mix"] = mixed

        wc_b = jnp.broadcast_to(wc_ref[...][None], (n, d_ch, c))   # hoisted
        bc = bc_ref[...]                               # (1, D_CH, 1)
        wd = wd_ref[...]                               # (1, D_CH)
        bd = bd_ref[...]                               # (1, 1)

        for s, name in enumerate(seg_srcs):            # static unroll (<=3)
            inp = srcs[name]                           # (N, C, S)
            # batched 1x1 conv, lane-dense spatial axis
            h = jnp.einsum("ndc,ncs->nds", wc_b, inp,
                           preferred_element_type=jnp.float32)     # (N,D_CH,S)
            h = jnp.maximum(h + bc, 0.0)
            pool = jnp.sum(h, axis=2)                  # (N, D_CH) lane reduce
            w_tot = wd + emb_ref[s]                    # (N, D_CH) projection
            logit = jnp.sum(w_tot * pool, axis=1, keepdims=True) + bd  # (N, 1)
            out_ref[s] = logit                         # resident, written once
            mid_ref[s] = pool
    return kernel


# ---------------------------------------------------------------------------
# Kernel wrappers
# ---------------------------------------------------------------------------

def generator(prep, z, y_emb):
    B = z.shape[0]
    zc = jnp.concatenate([z, y_emb], axis=1)           # (B, DIM_Z+SHARED_DIM)
    K = zc.shape[1]
    w = prep["g_w_fused"]                               # (K, 3*S0)
    b = prep["g_b_fused"]                               # (1, 3*S0)

    tb = min(B, 128)                                    # row tile, "parallel"
    # TODO(synk): at real BigGAN sizes also tile the output-column axis and
    # size tiles for the 256x256 MXU / v7x 64MiB VMEM.
    out = pl.pallas_call(
        _gen_kernel,
        out_shape=jax.ShapeDtypeStruct((B, 3 * S0), jnp.float32),
        grid=(pl.cdiv(B, tb),),
        in_specs=[
            pl.BlockSpec((tb, K), lambda i: (i, 0)),
            pl.BlockSpec((K, 3 * S0), lambda i: (0, 0)),
            pl.BlockSpec((1, 3 * S0), lambda i: (0, 0)),
        ],
        out_specs=pl.BlockSpec((tb, 3 * S0), lambda i: (i, 0)),
        compiler_params=pltpu.CompilerParams(dimension_semantics=("parallel",)),
    )(zc, w, b)

    # conv + tanh ran at bottom resolution (valid: both are spatially pointwise
    # and commute with nearest-neighbour upsampling).
    h = out.reshape(B, 3, BOTTOM, BOTTOM)
    up = IMG // BOTTOM
    return jnp.repeat(jnp.repeat(h, up, axis=2), up, axis=3)   # (B,3,IMG,IMG)


def run_discriminator(prep, seg_srcs, seg_classes, G_z, x=None, target_map=None):
    """Evaluate D on every segment (G_z / x / mixed) in ONE pallas_call.

    D is strictly per-sample, so per-segment evaluation is numerically
    identical to the PyTorch concat+split; the mixup blend is fused into the
    same kernel and `mixed` is emitted as an extra output.
    """
    N, C, H, W = G_z.shape
    S = H * W
    n_seg = len(seg_srcs)
    need_x = any(s in ("x", "mix") for s in seg_srcs)
    need_t = "mix" in seg_srcs

    # TODO(synk): at real sizes, pre-cast the activation DMA payloads to bf16
    # (emit bf16 from the generator) and tile samples/segments onto a parallel
    # grid; at toy sizes a single resident step minimizes launch overhead.
    inputs = [G_z.reshape(N, C, S)]
    in_specs = [pl.BlockSpec((N, C, S), lambda i: (0, 0, 0))]
    if need_x:
        inputs.append(x.reshape(N, C, S))
        in_specs.append(pl.BlockSpec((N, C, S), lambda i: (0, 0, 0)))
    if need_t:
        inputs.append(target_map.reshape(N, 1, S).astype(jnp.float32))
        in_specs.append(pl.BlockSpec((N, 1, S), lambda i: (0, 0, 0)))

    cls = jnp.stack(seg_classes, axis=0)                        # (NSEG, N)
    emb = jnp.take(prep["d_embed"], cls, axis=0)                # (NSEG, N, D_CH)
    inputs += [emb, prep["d_wc_t"], prep["d_bc"], prep["d_wd"], prep["d_bd"]]
    in_specs += [
        pl.BlockSpec((n_seg, N, D_CH), lambda i: (0, 0, 0)),
        pl.BlockSpec((D_CH, C), lambda i: (0, 0)),
        pl.BlockSpec((1, D_CH, 1), lambda i: (0, 0, 0)),
        pl.BlockSpec((1, D_CH), lambda i: (0, 0)),
        pl.BlockSpec((1, 1), lambda i: (0, 0)),
    ]

    out_shapes = [jax.ShapeDtypeStruct((n_seg, N, 1), jnp.float32),
                  jax.ShapeDtypeStruct((n_seg, N, D_CH), jnp.float32)]
    out_specs = [pl.BlockSpec((n_seg, N, 1), lambda i: (0, 0, 0)),
                 pl.BlockSpec((n_seg, N, D_CH), lambda i: (0, 0, 0))]
    if need_t:
        out_shapes.append(jax.ShapeDtypeStruct((N, C, S), jnp.float32))
        out_specs.append(pl.BlockSpec((N, C, S), lambda i: (0, 0, 0)))

    kernel = _make_disc_kernel(tuple(seg_srcs), need_x, need_t)
    res = pl.pallas_call(
        kernel,
        out_shape=tuple(out_shapes),
        grid=(1,),   # all segments & samples fit in one resident step here
        in_specs=in_specs,
        out_specs=tuple(out_specs),
        compiler_params=pltpu.CompilerParams(dimension_semantics=("arbitrary",)),
    )(*inputs)

    d_out, d_mid = res[0], res[1]
    mixed = res[2].reshape(N, C, H, W) if need_t else None
    outs = [d_out[s] for s in range(n_seg)]          # each (N, 1)
    mids = [d_mid[s] for s in range(n_seg)]          # each (N, D_CH)
    return outs, mids, mixed


# ---------------------------------------------------------------------------
# Synthetic G / D parameters, one-time prep, G.shared
# ---------------------------------------------------------------------------

def init_params(key):
    ks = jax.random.split(key, 8)
    s = 0.05
    return {
        # G.shared : class embedding
        "w_shared": s * jax.random.normal(ks[0], (N_CLASSES, SHARED_DIM), jnp.float32),
        # G: linear z||y -> G_CH*4*4 ; 1x1 conv G_CH -> 3 (+tanh, +NN upsample)
        "g_w1": s * jax.random.normal(ks[1], (DIM_Z + SHARED_DIM, G_CH * S0), jnp.float32),
        "g_b1": jnp.zeros((G_CH * S0,), jnp.float32),
        "g_w2": s * jax.random.normal(ks[2], (G_CH, 3), jnp.float32),
        "g_b2": jnp.zeros((3,), jnp.float32),
        # D: 1x1 conv 3 -> D_CH (+relu) ; sum-pool ; linear + class projection
        "d_wc": s * jax.random.normal(ks[3], (3, D_CH), jnp.float32),
        "d_bc": jnp.zeros((D_CH,), jnp.float32),
        "d_wd": s * jax.random.normal(ks[4], (D_CH, 1), jnp.float32),
        "d_bd": jnp.zeros((1,), jnp.float32),
        "d_embed": s * jax.random.normal(ks[5], (N_CLASSES, D_CH), jnp.float32),
    }


def preprocess_params(params):
    """One-time parameter prep (hoisted out of the per-forward wrappers).

    The generator's z||y linear (K -> G_CH*S0) and its 1x1 conv (G_CH -> 3)
    have no nonlinearity between them and fold exactly into one (K, 3*S0)
    weight: o[b, oc, s] = sum_k zc[b,k] * sum_c W1[k,c,s] * w2[c,oc] + ...
    """
    K = DIM_Z + SHARED_DIM
    w1 = params["g_w1"].reshape(K, G_CH, S0)
    w_fused = jnp.einsum("kcs,co->kos", w1, params["g_w2"]).reshape(K, 3 * S0)
    b1 = params["g_b1"].reshape(G_CH, S0)
    b_fused = (jnp.einsum("cs,co->os", b1, params["g_w2"])
               + params["g_b2"][:, None]).reshape(1, 3 * S0)
    return {
        "w_shared": params["w_shared"],
        "g_w_fused": w_fused,
        "g_b_fused": b_fused,
        "d_wc_t": params["d_wc"].T,                    # (D_CH, 3)
        "d_bc": params["d_bc"].reshape(1, D_CH, 1),
        "d_wd": params["d_wd"].reshape(1, D_CH),
        "d_bd": params["d_bd"].reshape(1, 1),
        "d_embed": params["d_embed"],
    }


def g_shared(prep, gy):
    return jnp.take(prep["w_shared"], gy, axis=0)      # embedding lookup (glue)


# ---------------------------------------------------------------------------
# G_D forward (mirrors the PyTorch wrapper)
# ---------------------------------------------------------------------------

def g_d_forward(prep, z, gy, x=None, dy=None, train_G=False, return_G_z=False,
                split_D=False, dw1=(), dw2=(), reference_x=None, mixup=False,
                mixup_only=False, target_map=None,
                config={"dataset": "FFHQ"}):
    # TODO(synk): split_D / dw1 / dw2 / reference_x are accepted but (as in the
    # reference forward body) unused; train_G (grad mode) is a no-op here.
    if mixup:
        gy = dy
    G_z = generator(prep, z, g_shared(prep, gy))
    # G.fp16 / D.fp16 are both False for this synthetic G/D -> no dtype cast

    # Segment list exactly as the PyTorch concat would build it; all segments
    # (and the mixup blend) are evaluated by ONE fused pallas_call.
    # (The dataset-dependent float()/long() cast of D_class only changes the
    # dtype of the concatenated label vector; labels stay int indices here.)
    if mixup_only:
        seg_srcs, seg_cls = ["mix"], [dy]
    elif x is None:
        seg_srcs, seg_cls = ["gz"], [gy]
    else:
        seg_srcs, seg_cls = ["gz", "x"], [gy, dy]
        if mixup:
            seg_srcs.append("mix")
            seg_cls.append(dy)

    outs, mids, mixed = run_discriminator(prep, seg_srcs, seg_cls, G_z, x=x,
                                          target_map=target_map)

    if mixup_only:
        G_z, x = None, None

    if x is not None:
        out = tuple(outs) + (G_z,)
        if mixup:
            out = out + (mixed,)
        out = out + tuple(mids)
        if mixup:
            out = out + (target_map,)
        return out
    else:
        out = (outs[0],)
        if return_G_z:
            out = out + (G_z,)
        if mixup_only:
            out = out + (mixed,)
        out = out + (mids[0],)
        if mixup:
            out = out + (target_map,)
        return out


# ---------------------------------------------------------------------------

if __name__ == "__main__":
    key = jax.random.PRNGKey(0)
    kp, kz, kx, kgy, kdy, ktm = jax.random.split(key, 6)

    params = init_params(kp)
    prep = preprocess_params(params)        # one-time weight prep (hoisted)

    B = 2
    z = jax.random.normal(kz, (B, DIM_Z), jnp.float32)
    x = jax.random.normal(kx, (B, 3, IMG, IMG), jnp.float32)   # real imgs, NCHW
    gy = jax.random.randint(kgy, (B,), 0, N_CLASSES, dtype=jnp.int32)
    dy = jax.random.randint(kdy, (B,), 0, N_CLASSES, dtype=jnp.int32)

    # standard (non-mixup) path: D on G_z and x with classes gy / dy
    outs = jax.block_until_ready(g_d_forward(prep, z, gy, x=x, dy=dy))
    d_fake, d_real, G_z, mid_fake, mid_real = outs
    assert d_fake.shape == (B, 1) and d_real.shape == (B, 1)
    assert G_z.shape == (B, 3, IMG, IMG)
    assert mid_fake.shape == (B, D_CH) and mid_real.shape == (B, D_CH)
    assert bool(jnp.all(jnp.isfinite(d_fake))) and bool(jnp.all(jnp.isfinite(d_real)))

    # mixup path (blend fused into the same single D kernel)
    target_map = (jax.random.uniform(ktm, (B, 1, IMG, IMG)) > 0.5).astype(jnp.float32)
    outs_mix = jax.block_until_ready(
        g_d_forward(prep, z, gy, x=x, dy=dy, mixup=True, target_map=target_map))
    # (d_fake, d_real, d_mixed, G_z, mixed, mid_fake, mid_real, mid_mixed, target_map)
    assert len(outs_mix) == 9
    assert outs_mix[0].shape == (B, 1) and outs_mix[2].shape == (B, 1)
    assert outs_mix[3].shape == (B, 3, IMG, IMG)
    assert outs_mix[4].shape == (B, 3, IMG, IMG)
    assert outs_mix[5].shape == (B, D_CH) and outs_mix[7].shape == (B, D_CH)
    assert outs_mix[8].shape == (B, 1, IMG, IMG)
    assert bool(jnp.all(jnp.isfinite(outs_mix[4])))

    print("KERNEL_OK")
</pallas_src>

<mosaic_0001>
module attributes {stable_mosaic.version = 11 : i64} {
  func.func @_gen_kernel(%arg0: i32, %arg1: memref<2x48xf32, #tpu.memory_space<vmem>>, %arg2: memref<48x48xf32, #tpu.memory_space<vmem>>, %arg3: memref<1x48xf32, #tpu.memory_space<vmem>>, %arg4: memref<2x48xf32, #tpu.memory_space<vmem>>) attributes {dimension_semantics = [#tpu.dimension_semantics<parallel>], iteration_bounds = array<i64: 1>, scalar_prefetch = 0 : i64, scratch_operands = 0 : i64, tpu.core_type = #tpu.core_type<tc>, window_params = [{transform_indices = @transform_0, window_bounds = array<i64: 2, 48>}, {pipeline_mode = #tpu.pipeline_mode<synchronous>, transform_indices = @transform_1, window_bounds = array<i64: 48, 48>}, {pipeline_mode = #tpu.pipeline_mode<synchronous>, transform_indices = @transform_2, window_bounds = array<i64: 1, 48>}, {transform_indices = @transform_3, window_bounds = array<i64: 2, 48>}]} {
    %c0 = arith.constant 0 : index
    %c0_0 = arith.constant 0 : index
    %0 = vector.load %arg1[%c0, %c0_0] : memref<2x48xf32, #tpu.memory_space<vmem>>, vector<2x48xf32>
    %c0_1 = arith.constant 0 : index
    %c0_2 = arith.constant 0 : index
    %1 = vector.load %arg2[%c0_1, %c0_2] : memref<48x48xf32, #tpu.memory_space<vmem>>, vector<48x48xf32>
    %cst = arith.constant dense<0.000000e+00> : vector<2x48xf32>
    %2 = tpu.matmul %0, %1, %cst {dimension_numbers = #tpu.dot_dimension_numbers<[1], [0], [0], [1], [0, 0, 1, 1], [], []>} : vector<2x48xf32>, vector<48x48xf32>, vector<2x48xf32> -> vector<2x48xf32>
    %c0_3 = arith.constant 0 : index
    %c0_4 = arith.constant 0 : index
    %3 = vector.load %arg3[%c0_3, %c0_4] : memref<1x48xf32, #tpu.memory_space<vmem>>, vector<1x48xf32>
    %4 = vector.broadcast %3 : vector<1x48xf32> to vector<2x48xf32>
    %5 = arith.addf %2, %4 : vector<2x48xf32>
    %6 = math.tanh %5 : vector<2x48xf32>
    %c0_5 = arith.constant 0 : index
    %c0_6 = arith.constant 0 : index
    %7 = vector.load %arg4[%c0_5, %c0_6] : memref<2x48xf32, #tpu.memory_space<vmem>>, vector<2x48xf32>
    tpu.vector_store %arg4[%c0_5, %c0_6], %6 {strides = array<i32>} : memref<2x48xf32, #tpu.memory_space<vmem>>, vector<2x48xf32>,
    return
  }
  func.func @transform_0(%arg0: i32) -> (i32, i32) {
    %c0_i32 = arith.constant 0 : i32
    %c0_i32_0 = arith.constant 0 : i32
    return %arg0, %c0_i32 : i32, i32
  }
  func.func @transform_1(%arg0: i32) -> (i32, i32) {
    %c0_i32 = arith.constant 0 : i32
    %c0_i32_0 = arith.constant 0 : i32
    %c0_i32_1 = arith.constant 0 : i32
    return %c0_i32, %c0_i32_0 : i32, i32
  }
  func.func @transform_2(%arg0: i32) -> (i32, i32) {
    %c0_i32 = arith.constant 0 : i32
    %c0_i32_0 = arith.constant 0 : i32
    %c0_i32_1 = arith.constant 0 : i32
    return %c0_i32, %c0_i32_0 : i32, i32
  }
  func.func @transform_3(%arg0: i32) -> (i32, i32) {
    %c0_i32 = arith.constant 0 : i32
    %c0_i32_0 = arith.constant 0 : i32
    return %arg0, %c0_i32 : i32, i32
  }
}

</mosaic_0001>

<bundles_post_ra>
// kernel: tpu_custom_call.1
= control target key start
LH: loop header
LB: loop body
LE: loop exit
PB: predicated region body
PF: predicated region fallthrough
CT: control target
= control target key end

     0   :  { %8 = vsyncpa [#allocation3], 0  ;;  %s225_s0 = inlined_call_operand.hbm [shape: f32[2,48], index: 0, kind: input, shape index: {}]   ;;  %s226_s1 = inlined_call_operand.hbm [shape: f32[48,48], index: 1, kind: input, shape index: {}]   ;;  %s227_s2 = inlined_call_operand.vmem [shape: f32[1,48], index: 2, kind: input, shape index: {}]   ;;  %s228_s3 = inlined_call_operand.hbm [shape: f32[2,48], index: 3, kind: output, shape index: {}]  }
   0x1   :  { %9 = vsyncpa [#allocation6], 0 }
   0x2   :  { %10 = vsyncpa [#allocation4], 0  ;;  %s16_s14 = sshll.u32 %s225_s0, 4  ;;  %s188_s15 = smov [#allocation2]   ;;  %s17_s14 = int_to_ptr.hbm [resolvable:$true] %s16_s14 }
   0x3   :  { %s18_s16 = sshll.u32 %s188_s15, 4  ;;  %s26_s19 = sshll.u32 %s226_s1, 4  ;;  %s19_s16 = int_to_ptr.vmem [resolvable:$true] %s18_s16  ;;  %s27_s19 = int_to_ptr.hbm [resolvable:$true] %s26_s19 }
   0x4   :  { %21 = dma.hbm_to_vmem [thread:$0]  %s17_s14, 32, %s19_s16, [#allocation3]  }
   0x5   :  { %s189_s20 = smov [#allocation5]   ;;  %s190_s22 = smov 128  }
   0x6   :  { %s28_s21 = sshll.u32 %s189_s20, 4  ;;  %s191_s23 = smov 8   ;;  %s29_s21 = int_to_ptr.vmem [resolvable:$true] %s28_s21 }
   0x7   :  { %34 = dma.hbm_to_vmem [thread:$0]  %s27_s19, 768, %s29_s21, [#allocation6], %s190_s22, %s190_s22, %s191_s23  }
   0x8   :  { %182 = dma.done.wait [#allocation3], 32  }
   0x9   :  { %183 = vsyncadd [#allocation3], 4294967264 }
   0xa   :  { %184 = dma.done.wait [#allocation6], 768  }
   0xb   :  { %185 = vsyncadd [#allocation6], 4294966528  ;;  %v51_v0 = vld [vmem:[#allocation5 + $0x28] sm:$0xff]  ;;  %v50_v1 = vld [vmem:[#allocation5 + $0x20] sm:$0xff]  ;;  %vm56_vm0 = vcmask 392192   ;;  %s192_s24 = smov [#allocation7]  }
   0xc   :  { %70 = vmatpush.msra.mxu0 %v51_v0  ;;  %v49_v2 = vld [vmem:[#allocation5 + $0x18] sm:$0xff]  ;;  %v48_v3 = vld [vmem:[#allocation5 + $0x10] sm:$0xff]  ;;  %v47_v4 = vld [vmem:[#allocation5 + $0x8] sm:$0xff]  ;;  %s88_s25 = sshll.u32 %s192_s24, 4  ;;  %s90_s28 = sshll.u32 %s228_s3, 4  ;;  %vm81_vm1 = vcmask 386048   ;;  %s89_s25 = int_to_ptr.vmem [resolvable:$true] %s88_s25  ;;  %s91_s28 = int_to_ptr.hbm [resolvable:$true] %s90_s28 }
   0xd   :  { %v46_v5 = vld [vmem:[#allocation5] sm:$0xff]  ;;  %v45_v6 = vld [vmem:[#allocation2] sm:$0x3] }
   0xe   :  { %71 = vmatpush.msra.mxu0 %v50_v1  ;;  %v107_v7 = vld [vmem:[%s227_s2] ss:$0 sm:$0xff] }
  0x10   :  { %72 = vmatpush.msra.mxu0 %v49_v2 }
  0x12   :  { %73 = vmatpush.msra.mxu0 %v48_v3 }
  0x14   :  { %74 = vmatpush.msra.mxu0 %v47_v4 }
  0x16   :  { %75 = vmatpush.msra.mxu0 %v46_v5 }
  0x17   :  { %101 = vmatmul.msk.f32.vlgmr.msra.gmra.mxu0 %vm56_vm0, %v45_v6 }
  0x94   :  { %v77_v8 = vpop.f32.mrf.mxu0 }
  0x95   :  { %v78_v9 = vadd.f32 %v107_v7, %v77_v8 }
  0x97   :  { %108 = vtanh.f32 %v78_v9 }
  0x9d   :  { %v109_v10 = vpop.eup %108 }
  0x9e   :  { %82 = vst.msk [vmem:[#allocation7] sm:$0x3] %vm81_vm1, %v109_v10 }
  0x9f   :  { %93 = dma.vmem_to_hbm [thread:$0]  %s89_s25, 32, %s91_s28, [#allocation4]  }
  0xa0   :  { %186 = dma.done.wait [#allocation4], 32  }
  0xa1   :  { %187 = vsyncadd [#allocation4], 4294967264 }
  0xa2   :  { %98 = vsyncpa [#allocation3], 1 }
  0xa3   :  { %99 = vsyncpa [#allocation6], 1 }
  0xa4   :  { %100 = vsyncpa [#allocation4], 1 }

</bundles_post_ra>
